<compile_context>
chip_gen: v5e
topology: v5e:2x2
jax: 0.10.0
libtpu: 0.0.40
codegen_flags: <defaults>
</compile_context>

<pallas_src>
import functools

import jax
import jax.numpy as jnp
from jax.experimental import pallas as pl
from jax.experimental.pallas import tpu as pltpu


def _pvn_kernel(inp_ref, wf_ref, be1_ref, we2_ref, be2_ref,
                wm_ref, bp1_ref, br1_ref, wp2_ref, bp2_ref,
                wr2_ref, br2_ref,
                preds_ref, recons_ref,
                *, TB, N, n_hid_e, n_hid_p, n_hid_r):
    f32 = jnp.float32
    cd = wf_ref.dtype                       # matmul operand dtype (bf16 or f32)
    R = TB * N

    inp = inp_ref[...]                      # (R, n_obs + n_act), compute dtype

    # --- fused first layer: [ emb_layer.w1 | recon_layer.w1(obs rows) ] -----
    first = jnp.dot(inp, wf_ref[...], preferred_element_type=f32)  # (R, He+Hr)
    h_e = jnp.maximum(first[:, :n_hid_e] + be1_ref[...], 0.0)      # emb hidden
    hr_obs = first[:, n_hid_e:]                                    # recon (obs part)

    # --- emb_layer second linear ---------------------------------------------
    embs = (jnp.dot(h_e.astype(cd), we2_ref[...], preferred_element_type=f32)
            + be2_ref[...])                                        # (R, n_emb)

    # --- mean over the inner batch (torch dim=1): reshape + sublane reduce ---
    emb_mean = jnp.mean(embs.reshape(TB, N, -1), axis=1)           # (TB, n_emb)

    # --- fused emb_mean consumers: [ pred_layer.w1 | recon_layer.w1(emb) ] ---
    mid = jnp.dot(emb_mean.astype(cd), wm_ref[...],
                  preferred_element_type=f32)                      # (TB, Hp+Hr)
    hp = jnp.maximum(mid[:, :n_hid_p] + bp1_ref[...], 0.0)
    pooled_h = mid[:, n_hid_p:] + br1_ref[...]                     # (TB, Hr)

    # --- pred head: VPU multiply + lane reduction (avoids an N=1 matmul) -----
    preds_ref[...] = (jnp.sum(hp * wp2_ref[...], axis=-1, keepdims=True)
                      + bp2_ref[...])                              # (TB, 1)

    # --- recon layer: broadcast pooled_h over the inner batch, add, ReLU -----
    hr3 = hr_obs.reshape(TB, N, n_hid_r) + pooled_h[:, None, :]
    hr = jnp.maximum(hr3, 0.0).reshape(R, n_hid_r)
    recons_ref[...] = (jnp.dot(hr.astype(cd), wr2_ref[...],
                               preferred_element_type=f32)
                       + br2_ref[...])                             # (R, n_act)


def _choose_tiling(B, N, target_rows, min_steps):
    """TB (batch elems / grid step, always a multiple of 8) and step count."""
    tb_cap = max(8, (target_rows // max(N, 1)) // 8 * 8)   # rows-per-step cap
    tb_need = -(-B // max(min_steps, 1))                    # ceil(B / min_steps)
    tb_need = -(-tb_need // 8) * 8                          # round up to 8
    TB = max(8, min(tb_cap, tb_need))
    steps = max(min_steps, -(-B // TB))
    if min_steps >= 2 and steps % 2 == 1:                   # v7x: even steps
        steps += 1
    return TB, steps


def _default_min_steps():
    # v7x has 2 TensorCores/chip -> keep an even number of >=2 grid steps so
    # both get work; v5e/v6e are single-TC so one big step minimizes overhead.
    try:
        kind = jax.devices()[0].device_kind.lower()
    except Exception:
        return 1
    return 2 if "v7" in kind else 1


def pvn_forward(obses, actions, params, *, compute_dtype=jnp.bfloat16,
                target_rows=4096, min_steps=None):
    B, N, n_obs = obses.shape
    n_act = actions.shape[2]
    n_emb = params["we2"].shape[1]
    n_hid_e = params["we1"].shape[1]
    n_hid_p = params["wp1"].shape[1]
    n_hid_r = params["wr1"].shape[1]
    n_in = n_obs + n_act

    if min_steps is None:
        min_steps = _default_min_steps()
    TB, steps = _choose_tiling(B, N, target_rows, min_steps)
    B_pad = TB * steps
    R = TB * N

    f32 = jnp.float32
    cd = jnp.dtype(compute_dtype)

    # Pad the outer batch with zeros so every (R, *) / (TB, 1) block is
    # 8-sublane aligned; padded rows are sliced off after the call.
    if B_pad != B:
        pad = B_pad - B
        obses = jnp.concatenate(
            [obses, jnp.zeros((pad, N, n_obs), obses.dtype)], axis=0)
        actions = jnp.concatenate(
            [actions, jnp.zeros((pad, N, n_act), actions.dtype)], axis=0)

    # One pre-concatenated input slab (the torch.cat([obses, actions], dim=2)).
    inp2d = (jnp.concatenate([obses, actions], axis=-1)
             .reshape(B_pad * N, n_in).astype(cd))

    # Fused first-layer weight: [ emb_layer.w1 | recon_layer.w1(obs rows) ],
    # recon part zero-padded over the action rows so one matmul serves both.
    wr1o_pad = jnp.concatenate(
        [params["wr1"][n_emb:], jnp.zeros((n_act, n_hid_r), f32)], axis=0)
    w_first = jnp.concatenate([params["we1"], wr1o_pad], axis=1).astype(cd)

    # Fused emb_mean consumers: [ pred_layer.w1 | recon_layer.w1(emb rows) ].
    w_mid = jnp.concatenate(
        [params["wp1"], params["wr1"][:n_emb]], axis=1).astype(cd)

    wp2v = params["wp2"].reshape(1, n_hid_p).astype(f32)   # pred head as a lane vector

    weight_args = (
        w_first, params["be1"].astype(f32),
        params["we2"].astype(cd), params["be2"].astype(f32),
        w_mid, params["bp1"].astype(f32), params["br1"].astype(f32),
        wp2v, params["bp2"].astype(f32),
        params["wr2"].astype(cd), params["br2"].astype(f32),
    )

    kernel = functools.partial(_pvn_kernel, TB=TB, N=N, n_hid_e=n_hid_e,
                               n_hid_p=n_hid_p, n_hid_r=n_hid_r)

    in_specs = [pl.BlockSpec((R, n_in), lambda b: (b, 0))] + [
        pl.BlockSpec(w.shape, lambda b: (0, 0)) for w in weight_args]
    out_specs = [
        pl.BlockSpec((TB, 1), lambda b: (b, 0)),
        pl.BlockSpec((R, n_act), lambda b: (b, 0)),
    ]

    preds, recons2d = pl.pallas_call(
        kernel,
        out_shape=(jax.ShapeDtypeStruct((B_pad, 1), f32),
                   jax.ShapeDtypeStruct((B_pad * N, n_act), f32)),
        grid_spec=pltpu.PrefetchScalarGridSpec(
            num_scalar_prefetch=0,
            grid=(steps,),
            in_specs=in_specs,
            out_specs=out_specs,
        ),
        compiler_params=pltpu.CompilerParams(
            dimension_semantics=("parallel",),
            vmem_limit_bytes=32 * 1024 * 1024),
    )(inp2d, *weight_args)

    return preds[:B], recons2d.reshape(B_pad, N, n_act)[:B]


# ---------------------------------------------------------------------------
# Parameter init + pure-JAX reference (networks.mlp assumed Linear-ReLU-Linear)
# ---------------------------------------------------------------------------
def init_mlp(key, n_in, n_hid, n_out):
    k1, k2 = jax.random.split(key)
    scale1 = 1.0 / jnp.sqrt(n_in)
    scale2 = 1.0 / jnp.sqrt(n_hid)
    w1 = jax.random.uniform(k1, (n_in, n_hid), jnp.float32, -scale1, scale1)
    b1 = jnp.zeros((1, n_hid), jnp.float32)
    w2 = jax.random.uniform(k2, (n_hid, n_out), jnp.float32, -scale2, scale2)
    b2 = jnp.zeros((1, n_out), jnp.float32)
    return w1, b1, w2, b2


def reference_forward(obses, actions, p):
    def mlp(x, w1, b1, w2, b2):
        return jnp.maximum(x @ w1 + b1, 0.0) @ w2 + b2
    emb_in = jnp.concatenate([obses, actions], axis=2)
    embs = mlp(emb_in, p["we1"], p["be1"], p["we2"], p["be2"])
    embs = jnp.mean(embs, axis=1)
    preds = mlp(embs, p["wp1"], p["bp1"], p["wp2"], p["bp2"])
    embs_b = jnp.broadcast_to(embs[:, None, :],
                              (obses.shape[0], obses.shape[1], embs.shape[-1]))
    recon_in = jnp.concatenate([embs_b, obses], axis=2)
    recons = mlp(recon_in, p["wr1"], p["br1"], p["wr2"], p["br2"])
    return preds, recons


if __name__ == "__main__":
    B, N = 4, 8          # outer batch, inner batch (N multiple of 8 keeps
    n_obs, n_act = 16, 4  # the in-kernel reshapes free)
    n_emb, n_hid = 32, 32

    key = jax.random.PRNGKey(0)
    k_obs, k_act, k_e, k_p, k_r = jax.random.split(key, 5)

    obses = jax.random.normal(k_obs, (B, N, n_obs), jnp.float32)
    actions = jax.random.normal(k_act, (B, N, n_act), jnp.float32)

    we1, be1, we2, be2 = init_mlp(k_e, n_obs + n_act, n_hid, n_emb)
    wp1, bp1, wp2, bp2 = init_mlp(k_p, n_emb, n_hid, 1)
    wr1, br1, wr2, br2 = init_mlp(k_r, n_emb + n_obs, n_hid, n_act)

    params = dict(we1=we1, be1=be1, we2=we2, be2=be2,
                  wp1=wp1, bp1=bp1, wp2=wp2, bp2=bp2,
                  wr1=wr1, br1=br1, wr2=wr2, br2=br2)

    preds_ref, recons_ref = reference_forward(obses, actions, params)

    # f32 matmul operands: tight check against the reference.
    preds32, recons32 = pvn_forward(obses, actions, params,
                                    compute_dtype=jnp.float32)
    jax.block_until_ready((preds32, recons32))
    assert preds32.shape == (B, 1) and recons32.shape == (B, N, n_act)
    assert jnp.allclose(preds32, preds_ref, atol=1e-4, rtol=1e-4)
    assert jnp.allclose(recons32, recons_ref, atol=1e-4, rtol=1e-4)

    # default bf16 matmul operands (f32 accumulation): looser tolerance.
    preds16, recons16 = pvn_forward(obses, actions, params)
    jax.block_until_ready((preds16, recons16))
    assert preds16.shape == (B, 1) and recons16.shape == (B, N, n_act)
    assert jnp.allclose(preds16, preds_ref, atol=5e-2, rtol=5e-2)
    assert jnp.allclose(recons16, recons_ref, atol=5e-2, rtol=5e-2)

    print("KERNEL_OK")
</pallas_src>

<mosaic_0001>
module attributes {stable_mosaic.version = 11 : i64} {
  func.func @_pvn_kernel(%arg0: i32, %arg1: memref<64x20xf32, #tpu.memory_space<vmem>>, %arg2: memref<20x64xf32, #tpu.memory_space<vmem>>, %arg3: memref<1x32xf32, #tpu.memory_space<vmem>>, %arg4: memref<32x32xf32, #tpu.memory_space<vmem>>, %arg5: memref<1x32xf32, #tpu.memory_space<vmem>>, %arg6: memref<32x64xf32, #tpu.memory_space<vmem>>, %arg7: memref<1x32xf32, #tpu.memory_space<vmem>>, %arg8: memref<1x32xf32, #tpu.memory_space<vmem>>, %arg9: memref<1x32xf32, #tpu.memory_space<vmem>>, %arg10: memref<1x1xf32, #tpu.memory_space<vmem>>, %arg11: memref<32x4xf32, #tpu.memory_space<vmem>>, %arg12: memref<1x4xf32, #tpu.memory_space<vmem>>, %arg13: memref<8x1xf32, #tpu.memory_space<vmem>>, %arg14: memref<64x4xf32, #tpu.memory_space<vmem>>) attributes {dimension_semantics = [#tpu.dimension_semantics<parallel>], iteration_bounds = array<i64: 1>, scalar_prefetch = 0 : i64, scratch_operands = 0 : i64, tpu.core_type = #tpu.core_type<tc>, window_params = [{transform_indices = @transform_0, window_bounds = array<i64: 64, 20>}, {pipeline_mode = #tpu.pipeline_mode<synchronous>, transform_indices = @transform_1, window_bounds = array<i64: 20, 64>}, {pipeline_mode = #tpu.pipeline_mode<synchronous>, transform_indices = @transform_2, window_bounds = array<i64: 1, 32>}, {pipeline_mode = #tpu.pipeline_mode<synchronous>, transform_indices = @transform_3, window_bounds = array<i64: 32, 32>}, {pipeline_mode = #tpu.pipeline_mode<synchronous>, transform_indices = @transform_4, window_bounds = array<i64: 1, 32>}, {pipeline_mode = #tpu.pipeline_mode<synchronous>, transform_indices = @transform_5, window_bounds = array<i64: 32, 64>}, {pipeline_mode = #tpu.pipeline_mode<synchronous>, transform_indices = @transform_6, window_bounds = array<i64: 1, 32>}, {pipeline_mode = #tpu.pipeline_mode<synchronous>, transform_indices = @transform_7, window_bounds = array<i64: 1, 32>}, {pipeline_mode = #tpu.pipeline_mode<synchronous>, transform_indices = @transform_8, window_bounds = array<i64: 1, 32>}, {pipeline_mode = #tpu.pipeline_mode<synchronous>, transform_indices = @transform_9, window_bounds = array<i64: 1, 1>}, {pipeline_mode = #tpu.pipeline_mode<synchronous>, transform_indices = @transform_10, window_bounds = array<i64: 32, 4>}, {pipeline_mode = #tpu.pipeline_mode<synchronous>, transform_indices = @transform_11, window_bounds = array<i64: 1, 4>}, {transform_indices = @transform_12, window_bounds = array<i64: 8, 1>}, {transform_indices = @transform_13, window_bounds = array<i64: 64, 4>}]} {
    %c0 = arith.constant 0 : index
    %c0_0 = arith.constant 0 : index
    %0 = vector.load %arg1[%c0, %c0_0] : memref<64x20xf32, #tpu.memory_space<vmem>>, vector<64x20xf32>
    %c0_1 = arith.constant 0 : index
    %c0_2 = arith.constant 0 : index
    %1 = vector.load %arg2[%c0_1, %c0_2] : memref<20x64xf32, #tpu.memory_space<vmem>>, vector<20x64xf32>
    %cst = arith.constant dense<0.000000e+00> : vector<64x64xf32>
    %2 = tpu.matmul %0, %1, %cst {dimension_numbers = #tpu.dot_dimension_numbers<[1], [0], [0], [1], [0, 0, 1, 1], [], []>} : vector<64x20xf32>, vector<20x64xf32>, vector<64x64xf32> -> vector<64x64xf32>
    %3 = vector.extract_strided_slice %2 {offsets = [0, 0], sizes = [64, 32], strides = [1, 1]} : vector<64x64xf32> to vector<64x32xf32>
    %c0_3 = arith.constant 0 : index
    %c0_4 = arith.constant 0 : index
    %4 = vector.load %arg3[%c0_3, %c0_4] : memref<1x32xf32, #tpu.memory_space<vmem>>, vector<1x32xf32>
    %5 = vector.broadcast %4 : vector<1x32xf32> to vector<64x32xf32>
    %6 = arith.addf %3, %5 : vector<64x32xf32>
    %cst_5 = arith.constant 0.000000e+00 : f32
    %7 = vector.broadcast %cst_5 : f32 to vector<64x32xf32>
    %8 = arith.maximumf %6, %7 : vector<64x32xf32>
    %9 = vector.extract_strided_slice %2 {offsets = [0, 32], sizes = [64, 32], strides = [1, 1]} : vector<64x64xf32> to vector<64x32xf32>
    %c0_6 = arith.constant 0 : index
    %c0_7 = arith.constant 0 : index
    %10 = vector.load %arg4[%c0_6, %c0_7] : memref<32x32xf32, #tpu.memory_space<vmem>>, vector<32x32xf32>
    %cst_8 = arith.constant dense<0.000000e+00> : vector<64x32xf32>
    %11 = tpu.matmul %8, %10, %cst_8 {dimension_numbers = #tpu.dot_dimension_numbers<[1], [0], [0], [1], [0, 0, 1, 1], [], []>} : vector<64x32xf32>, vector<32x32xf32>, vector<64x32xf32> -> vector<64x32xf32>
    %c0_9 = arith.constant 0 : index
    %c0_10 = arith.constant 0 : index
    %12 = vector.load %arg5[%c0_9, %c0_10] : memref<1x32xf32, #tpu.memory_space<vmem>>, vector<1x32xf32>
    %13 = vector.broadcast %12 : vector<1x32xf32> to vector<64x32xf32>
    %14 = arith.addf %11, %13 : vector<64x32xf32>
    %15 = vector.shape_cast %14 : vector<64x32xf32> to vector<8x8x32xf32>
    %cst_11 = arith.constant dense<0.000000e+00> : vector<8x32xf32>
    %16 = vector.multi_reduction <add>, %15, %cst_11 [1] : vector<8x8x32xf32> to vector<8x32xf32>
    %cst_12 = arith.constant 8.000000e+00 : f32
    %17 = vector.broadcast %cst_12 : f32 to vector<8x32xf32>
    %18 = arith.divf %16, %17 : vector<8x32xf32>
    %c0_13 = arith.constant 0 : index
    %c0_14 = arith.constant 0 : index
    %19 = vector.load %arg6[%c0_13, %c0_14] : memref<32x64xf32, #tpu.memory_space<vmem>>, vector<32x64xf32>
    %cst_15 = arith.constant dense<0.000000e+00> : vector<8x64xf32>
    %20 = tpu.matmul %18, %19, %cst_15 {dimension_numbers = #tpu.dot_dimension_numbers<[1], [0], [0], [1], [0, 0, 1, 1], [], []>} : vector<8x32xf32>, vector<32x64xf32>, vector<8x64xf32> -> vector<8x64xf32>
    %21 = vector.extract_strided_slice %20 {offsets = [0, 0], sizes = [8, 32], strides = [1, 1]} : vector<8x64xf32> to vector<8x32xf32>
    %c0_16 = arith.constant 0 : index
    %c0_17 = arith.constant 0 : index
    %22 = vector.load %arg7[%c0_16, %c0_17] : memref<1x32xf32, #tpu.memory_space<vmem>>, vector<1x32xf32>
    %23 = vector.broadcast %22 : vector<1x32xf32> to vector<8x32xf32>
    %24 = arith.addf %21, %23 : vector<8x32xf32>
    %cst_18 = arith.constant 0.000000e+00 : f32
    %25 = vector.broadcast %cst_18 : f32 to vector<8x32xf32>
    %26 = arith.maximumf %24, %25 : vector<8x32xf32>
    %27 = vector.extract_strided_slice %20 {offsets = [0, 32], sizes = [8, 32], strides = [1, 1]} : vector<8x64xf32> to vector<8x32xf32>
    %c0_19 = arith.constant 0 : index
    %c0_20 = arith.constant 0 : index
    %28 = vector.load %arg8[%c0_19, %c0_20] : memref<1x32xf32, #tpu.memory_space<vmem>>, vector<1x32xf32>
    %29 = vector.broadcast %28 : vector<1x32xf32> to vector<8x32xf32>
    %30 = arith.addf %27, %29 : vector<8x32xf32>
    %c0_21 = arith.constant 0 : index
    %c0_22 = arith.constant 0 : index
    %31 = vector.load %arg9[%c0_21, %c0_22] : memref<1x32xf32, #tpu.memory_space<vmem>>, vector<1x32xf32>
    %32 = vector.broadcast %31 : vector<1x32xf32> to vector<8x32xf32>
    %33 = arith.mulf %26, %32 : vector<8x32xf32>
    %cst_23 = arith.constant dense<0.000000e+00> : vector<8xf32>
    %34 = vector.multi_reduction <add>, %33, %cst_23 [1] : vector<8x32xf32> to vector<8xf32>
    %35 = vector.shape_cast %34 : vector<8xf32> to vector<8x1xf32>
    %c0_24 = arith.constant 0 : index
    %c0_25 = arith.constant 0 : index
    %36 = vector.load %arg10[%c0_24, %c0_25] : memref<1x1xf32, #tpu.memory_space<vmem>>, vector<1x1xf32>
    %37 = vector.broadcast %36 : vector<1x1xf32> to vector<8x1xf32>
    %38 = arith.addf %35, %37 : vector<8x1xf32>
    %c0_26 = arith.constant 0 : index
    %c0_27 = arith.constant 0 : index
    %39 = vector.load %arg13[%c0_26, %c0_27] : memref<8x1xf32, #tpu.memory_space<vmem>>, vector<8x1xf32>
    tpu.vector_store %arg13[%c0_26, %c0_27], %38 {strides = array<i32>} : memref<8x1xf32, #tpu.memory_space<vmem>>, vector<8x1xf32>,
    %40 = vector.shape_cast %9 : vector<64x32xf32> to vector<8x8x32xf32>
    %41 = vector.shape_cast %30 : vector<8x32xf32> to vector<8x1x32xf32>
    %42 = vector.broadcast %41 : vector<8x1x32xf32> to vector<8x8x32xf32>
    %43 = arith.addf %40, %42 : vector<8x8x32xf32>
    %cst_28 = arith.constant 0.000000e+00 : f32
    %44 = vector.broadcast %cst_28 : f32 to vector<8x8x32xf32>
    %45 = arith.maximumf %43, %44 : vector<8x8x32xf32>
    %46 = vector.shape_cast %45 : vector<8x8x32xf32> to vector<64x32xf32>
    %c0_29 = arith.constant 0 : index
    %c0_30 = arith.constant 0 : index
    %47 = vector.load %arg11[%c0_29, %c0_30] : memref<32x4xf32, #tpu.memory_space<vmem>>, vector<32x4xf32>
    %cst_31 = arith.constant dense<0.000000e+00> : vector<64x4xf32>
    %48 = tpu.matmul %46, %47, %cst_31 {dimension_numbers = #tpu.dot_dimension_numbers<[1], [0], [0], [1], [0, 0, 1, 1], [], []>} : vector<64x32xf32>, vector<32x4xf32>, vector<64x4xf32> -> vector<64x4xf32>
    %c0_32 = arith.constant 0 : index
    %c0_33 = arith.constant 0 : index
    %49 = vector.load %arg12[%c0_32, %c0_33] : memref<1x4xf32, #tpu.memory_space<vmem>>, vector<1x4xf32>
    %50 = vector.broadcast %49 : vector<1x4xf32> to vector<64x4xf32>
    %51 = arith.addf %48, %50 : vector<64x4xf32>
    %c0_34 = arith.constant 0 : index
    %c0_35 = arith.constant 0 : index
    %52 = vector.load %arg14[%c0_34, %c0_35] : memref<64x4xf32, #tpu.memory_space<vmem>>, vector<64x4xf32>
    tpu.vector_store %arg14[%c0_34, %c0_35], %51 {strides = array<i32>} : memref<64x4xf32, #tpu.memory_space<vmem>>, vector<64x4xf32>,
    return
  }
  func.func @transform_0(%arg0: i32) -> (i32, i32) {
    %c0_i32 = arith.constant 0 : i32
    %c0_i32_0 = arith.constant 0 : i32
    return %arg0, %c0_i32 : i32, i32
  }
  func.func @transform_1(%arg0: i32) -> (i32, i32) {
    %c0_i32 = arith.constant 0 : i32
    %c0_i32_0 = arith.constant 0 : i32
    %c0_i32_1 = arith.constant 0 : i32
    return %c0_i32, %c0_i32_0 : i32, i32
  }
  func.func @transform_2(%arg0: i32) -> (i32, i32) {
    %c0_i32 = arith.constant 0 : i32
    %c0_i32_0 = arith.constant 0 : i32
    %c0_i32_1 = arith.constant 0 : i32
    return %c0_i32, %c0_i32_0 : i32, i32
  }
  func.func @transform_3(%arg0: i32) -> (i32, i32) {
    %c0_i32 = arith.constant 0 : i32
    %c0_i32_0 = arith.constant 0 : i32
    %c0_i32_1 = arith.constant 0 : i32
    return %c0_i32, %c0_i32_0 : i32, i32
  }
  func.func @transform_4(%arg0: i32) -> (i32, i32) {
    %c0_i32 = arith.constant 0 : i32
    %c0_i32_0 = arith.constant 0 : i32
    %c0_i32_1 = arith.constant 0 : i32
    return %c0_i32, %c0_i32_0 : i32, i32
  }
  func.func @transform_5(%arg0: i32) -> (i32, i32) {
    %c0_i32 = arith.constant 0 : i32
    %c0_i32_0 = arith.constant 0 : i32
    %c0_i32_1 = arith.constant 0 : i32
    return %c0_i32, %c0_i32_0 : i32, i32
  }
  func.func @transform_6(%arg0: i32) -> (i32, i32) {
    %c0_i32 = arith.constant 0 : i32
    %c0_i32_0 = arith.constant 0 : i32
    %c0_i32_1 = arith.constant 0 : i32
    return %c0_i32, %c0_i32_0 : i32, i32
  }
  func.func @transform_7(%arg0: i32) -> (i32, i32) {
    %c0_i32 = arith.constant 0 : i32
    %c0_i32_0 = arith.constant 0 : i32
    %c0_i32_1 = arith.constant 0 : i32
    return %c0_i32, %c0_i32_0 : i32, i32
  }
  func.func @transform_8(%arg0: i32) -> (i32, i32) {
    %c0_i32 = arith.constant 0 : i32
    %c0_i32_0 = arith.constant 0 : i32
    %c0_i32_1 = arith.constant 0 : i32
    return %c0_i32, %c0_i32_0 : i32, i32
  }
  func.func @transform_9(%arg0: i32) -> (i32, i32) {
    %c0_i32 = arith.constant 0 : i32
    %c0_i32_0 = arith.constant 0 : i32
    %c0_i32_1 = arith.constant 0 : i32
    return %c0_i32, %c0_i32_0 : i32, i32
  }
  func.func @transform_10(%arg0: i32) -> (i32, i32) {
    %c0_i32 = arith.constant 0 : i32
    %c0_i32_0 = arith.constant 0 : i32
    %c0_i32_1 = arith.constant 0 : i32
    return %c0_i32, %c0_i32_0 : i32, i32
  }
  func.func @transform_11(%arg0: i32) -> (i32, i32) {
    %c0_i32 = arith.constant 0 : i32
    %c0_i32_0 = arith.constant 0 : i32
    %c0_i32_1 = arith.constant 0 : i32
    return %c0_i32, %c0_i32_0 : i32, i32
  }
  func.func @transform_12(%arg0: i32) -> (i32, i32) {
    %c0_i32 = arith.constant 0 : i32
    %c0_i32_0 = arith.constant 0 : i32
    return %arg0, %c0_i32 : i32, i32
  }
  func.func @transform_13(%arg0: i32) -> (i32, i32) {
    %c0_i32 = arith.constant 0 : i32
    %c0_i32_0 = arith.constant 0 : i32
    return %arg0, %c0_i32 : i32, i32
  }
}

</mosaic_0001>

<bundles_post_ra>
// kernel: tpu_custom_call.1
= control target key start
LH: loop header
LB: loop body
LE: loop exit
PB: predicated region body
PF: predicated region fallthrough
CT: control target
= control target key end

     0   :  { %vm81_vm0 = vcmask 1043456   ;;  %vm56_vm1 = vcmask 162816   ;;  %vm154_vm2 = vcmask 261120   ;;  %v562_v52 = vmov 8.0   ;;  %s836_s1 = inlined_call_operand.vmem [shape: f32[20,64], index: 1, kind: input, shape index: {}]   ;;  %s837_s0 = inlined_call_operand.vmem [shape: f32[64,20], index: 0, kind: input, shape index: {}]   ;;  %s838_s2 = inlined_call_operand.vmem [shape: f32[1,32], index: 2, kind: input, shape index: {}]   ;;  %s839_s3 = inlined_call_operand.vmem [shape: f32[32,32], index: 3, kind: input, shape index: {}]   ;;  %s840_s4 = inlined_call_operand.vmem [shape: f32[1,32], index: 4, kind: input, shape index: {}]   ;;  %s841_s7 = inlined_call_operand.vmem [shape: f32[1,32], index: 7, kind: input, shape index: {}]   ;;  %s842_s6 = inlined_call_operand.vmem [shape: f32[1,32], index: 6, kind: input, shape index: {}]   ;;  %s843_s5 = inlined_call_operand.vmem [shape: f32[32,64], index: 5, kind: input, shape index: {}]   ;;  %s844_s8 = inlined_call_operand.vmem [shape: f32[1,32], index: 8, kind: input, shape index: {}]   ;;  %s845_s11 = inlined_call_operand.vmem [shape: f32[1,4], index: 11, kind: input, shape index: {}]   ;;  %s846_s10 = inlined_call_operand.vmem [shape: f32[32,4], index: 10, kind: input, shape index: {}]   ;;  %s847_s9 = inlined_call_operand.<no memory space> [shape: f32[1,1], index: 9, kind: input, shape index: {}]   ;;  %s848_s12 = inlined_call_operand.vmem [shape: f32[8,1], index: 12, kind: output, shape index: {0}]   ;;  %s849_s13 = inlined_call_operand.vmem [shape: f32[64,4], index: 13, kind: output, shape index: {1}]  }
   0x1   :  { %v55_v0 = vld [vmem:[%s836_s1 + $0x10] sm:$0xf]  ;;  %v54_v1 = vld [vmem:[%s836_s1 + $0x8] sm:$0xff]  ;;  %v53_v2 = vld [vmem:[%s836_s1] sm:$0xff]  ;;  %560 = vrcp.f32 %v562_v52  ;;  %vm303_vm4 = vcmask 1041409   ;;  %vm305_vm5 = vcmask 1042434  }
   0x2   :  { %513 = vmatpush.msk.msra.mxu0 %vm81_vm0, %v55_v0  ;;  %539 = vmatpush.msk.msra.mxu2 %vm81_vm0, %v55_v0  ;;  %v45_v3 = vld [vmem:[%s837_s0] sm:$0xff]  ;;  %v52_v4 = vld [vmem:[%s837_s0 + $0x38] sm:$0xff]  ;;  %v46_v5 = vld [vmem:[%s837_s0 + $0x8] sm:$0xff]  ;;  %vm307_vm6 = vcmask 1043459   ;;  %vm309_vm7 = vcmask 1044484   ;;  %vm311_vm8 = vcmask 1045509  }
   0x3   :  { %v47_v6 = vld [vmem:[%s837_s0 + $0x10] sm:$0xff]  ;;  %v149_v7 = vld [vmem:[%s839_s3 + $0x18] sm:$0xff]  ;;  %v49_v9 = vld [vmem:[%s837_s0 + $0x20] sm:$0xff]  ;;  %vm313_vm9 = vcmask 1046534   ;;  %vm315_vm10 = vcmask 1047559   ;;  %vm365_vm11 = vcmask 7168  }
   0x4   :  { %99 = vmatpush.msra.mxu0 %v54_v1  ;;  %540 = vmatpush.msra.mxu2 %v54_v1  ;;  %v48_v8 = vld [vmem:[%s837_s0 + $0x18] sm:$0xff]  ;;  %v50_v10 = vld [vmem:[%s837_s0 + $0x28] sm:$0xff]  ;;  %v51_v11 = vld [vmem:[%s837_s0 + $0x30] sm:$0xff]  ;;  %vm496_vm12 = vcmask 31744  }
   0x5   :  { %191 = vmatpush.msra.mxu1 %v149_v7  ;;  %v148_v12 = vld [vmem:[%s839_s3 + $0x10] sm:$0xff]  ;;  %v147_v13 = vld [vmem:[%s839_s3 + $0x8] sm:$0xff]  ;;  %v146_v14 = vld [vmem:[%s839_s3] sm:$0xff] }
   0x6   :  { %100 = vmatpush.msra.mxu0 %v53_v2  ;;  %541 = vmatpush.msra.mxu2 %v53_v2  ;;  %v553_v15 = vld [vmem:[%s838_s2] ss:$0 sm:$0xff]  ;;  %v294_v49 = vld [vmem:[%s843_s5 + $0x18] sm:$0xff]  ;;  %v293_v51 = vld [vmem:[%s843_s5 + $0x10] sm:$0xff] }
   0x7   :  { %514 = vmatmul.msk.f32.vlgmr.msra.gmra.mxu0 %vm56_vm1, %v45_v3  ;;  %521 = vmatmul.msk.f32.vlgmr.msra.gmra.mxu2 %vm56_vm1, %v52_v4  ;;  %v726_v43 = vld [vmem:[%s840_s4] ss:$0 sm:$0xff]  ;;  %v292_v58 = vld [vmem:[%s843_s5 + $0x8] sm:$0xff] }
   0x8   :  { %542 = vmatpush.msrb.mxu2 %v149_v7  ;;  %192 = vmatpush.msra.mxu1 %v148_v12  ;;  %v291_v59 = vld [vmem:[%s843_s5] sm:$0xff]  ;;  %s563_s5 = smov 32  }
   0x9   :  { %v555_v4 = vld [vmem:[%s841_s7] ss:$0 sm:$0xff]  ;;  %s564_s7 = smov 96  }
   0xa   :  { %543 = vmatpush.msrb.mxu2 %v148_v12  ;;  %193 = vmatpush.msra.mxu1 %v147_v13 }
   0xb   :  { %348 = vrot.lane.b32.xlu0 %v555_v4, %s563_s5 }
   0xc   :  { %544 = vmatpush.msrb.mxu2 %v147_v13  ;;  %194 = vmatpush.msra.mxu1 %v146_v14 }
   0xe   :  { %545 = vmatpush.msrb.mxu2 %v146_v14 }
   0xf   :  { %515 = vmatmul.msk.f32.gmra.mxu0 %vm56_vm1, %v46_v5  ;;  %v561_v5 = vpop.eup %560 }
  0x10   :  { %331 = vmatpush.msra.mxu2 %v294_v49  ;;  %vm281_vm3 = vweird.f32 %v561_v5 }
  0x12   :  { %332 = vmatpush.msra.mxu2 %v293_v51 }
  0x14   :  { %333 = vmatpush.msra.mxu2 %v292_v58 }
  0x16   :  { %334 = vmatpush.msra.mxu2 %v291_v59 }
  0x17   :  { %516 = vmatmul.msk.f32.gmra.mxu0 %vm56_vm1, %v47_v6 }
  0x1f   :  { %517 = vmatmul.msk.f32.gmra.mxu0 %vm56_vm1, %v48_v8 }
  0x27   :  { %518 = vmatmul.msk.f32.gmra.mxu0 %vm56_vm1, %v49_v9 }
  0x2f   :  { %519 = vmatmul.msk.f32.gmra.mxu0 %vm56_vm1, %v50_v10 }
  0x37   :  { %520 = vmatmul.msk.f32.gmra.mxu0 %vm56_vm1, %v51_v11  ;;  %v277_v11 = vmul.f32 8.0, %v561_v5 }
  0x84   :  { %v691_v16 = vpop.f32.mrf.mxu0 }
  0x85   :  { %v130_v17 = vadd.f32 %v553_v15, %v691_v16 }
  0x87   :  { %v138_v18 = vmax.f32 %v130_v17, 0.0 }
  0x89   :  { %522 = vmatmul.msk.f32.vlgmr.msra.gmra.mxu1 %vm154_vm2, %v138_v18 }
  0x8a   :  { %v695_v19 = vpop.f32.mrf.mxu2 }
  0x8b   :  { %v137_v20 = vadd.f32 %v553_v15, %v695_v19 }
  0x8c   :  { %v698_v21 = vpop.f32.mrf.mxu0 }
  0x8d   :  { %v131_v22 = vadd.f32 %v553_v15, %v698_v21  ;;  %v145_v23 = vmax.f32 %v137_v20, 0.0 }
  0x8f   :  { %v139_v24 = vmax.f32 %v131_v22, 0.0  ;;  %529 = vmatmul.msk.f32.vlgmr.msrb.gmra.mxu2 %vm154_vm2, %v145_v23 }
  0x91   :  { %523 = vmatmul.msk.f32.gmra.mxu1 %vm154_vm2, %v139_v24  ;;  %v278_v24 = vsub.f32 1.0, %v277_v11 }
  0x94   :  { %v703_v25 = vpop.f32.mrf.mxu0 }
  0x95   :  { %v132_v26 = vadd.f32 %v553_v15, %v703_v25 }
  0x97   :  { %v140_v27 = vmax.f32 %v132_v26, 0.0 }
  0x99   :  { %524 = vmatmul.msk.f32.gmra.mxu1 %vm154_vm2, %v140_v27 }
  0x9c   :  { %v707_v28 = vpop.f32.mrf.mxu0 }
  0x9d   :  { %v133_v29 = vadd.f32 %v553_v15, %v707_v28 }
  0x9f   :  { %v141_v30 = vmax.f32 %v133_v29, 0.0 }
  0xa1   :  { %525 = vmatmul.msk.f32.gmra.mxu1 %vm154_vm2, %v141_v30 }
  0xa4   :  { %v711_v31 = vpop.f32.mrf.mxu0 }
  0xa5   :  { %v134_v32 = vadd.f32 %v553_v15, %v711_v31 }
  0xa7   :  { %v142_v33 = vmax.f32 %v134_v32, 0.0 }
  0xa9   :  { %526 = vmatmul.msk.f32.gmra.mxu1 %vm154_vm2, %v142_v33 }
  0xac   :  { %v715_v34 = vpop.f32.mrf.mxu0 }
  0xad   :  { %v135_v35 = vadd.f32 %v553_v15, %v715_v34 }
  0xaf   :  { %v143_v36 = vmax.f32 %v135_v35, 0.0 }
  0xb1   :  { %527 = vmatmul.msk.f32.gmra.mxu1 %vm154_vm2, %v143_v36 }
  0xb4   :  { %v719_v37 = vpop.f32.mrf.mxu0 }
  0xb5   :  { %v136_v38 = vadd.f32 %v553_v15, %v719_v37 }
  0xb7   :  { %v144_v39 = vmax.f32 %v136_v38, 0.0  ;;  %v279_v38 = vmul.f32 %v561_v5, %v278_v24 }
  0xb9   :  { %528 = vmatmul.msk.f32.gmra.mxu1 %vm154_vm2, %v144_v39  ;;  %v280_v51 = vadd.f32 %v561_v5, %v279_v38 }
 0x106   :  { %v196_v40 = vpop.f32.mrf.mxu1 }
 0x107   :  { %v197_v47 = vadd.f32 %v726_v43, %v196_v40 }
 0x109   :  { %v220_v55 = vsel %vm154_vm2, %v197_v47, 0.0 }
 0x10a   :  { %v221_v0 = vrot.slane %v220_v55, 4 }
 0x10c   :  { %v222_v9 = vadd.f32 %v221_v0, %v220_v55 }
 0x10e   :  { %v199_v41 = vpop.f32.mrf.mxu1  ;;  %v223_v20 = vrot.slane %v222_v9, 2 }
 0x10f   :  { %v200_v45 = vadd.f32 %v726_v43, %v199_v41 }
 0x110   :  { %v224_v35 = vadd.f32 %v223_v20, %v222_v9 }
 0x111   :  { %v227_v50 = vsel %vm154_vm2, %v200_v45, 0.0 }
 0x112   :  { %v217_v54 = vpop.f32.mrf.mxu2  ;;  %v228_v60 = vrot.slane %v227_v50, 4 }
 0x113   :  { %v218_v63 = vadd.f32 %v726_v43, %v217_v54 }
 0x114   :  { %v229_v6 = vadd.f32 %v228_v60, %v227_v50 }
 0x115   :  { %v269_v8 = vsel %vm154_vm2, %v218_v63, 0.0 }
 0x116   :  { %v202_v42 = vpop.f32.mrf.mxu1  ;;  %v230_v14 = vrot.slane %v229_v6, 2  ;;  %v270_v17 = vrot.slane %v269_v8, 4 }
 0x117   :  { %v203_v46 = vadd.f32 %v726_v43, %v202_v42 }
 0x118   :  { %v231_v29 = vadd.f32 %v230_v14, %v229_v6  ;;  %v271_v30 = vadd.f32 %v270_v17, %v269_v8 }
 0x119   :  { %v234_v53 = vsel %vm154_vm2, %v203_v46, 0.0 }
 0x11a   :  { %v235_v62 = vrot.slane %v234_v53, 4  ;;  %v232_v42 = vrot.slane %v231_v29, 1 }
 0x11c   :  { %v236_v7 = vadd.f32 %v235_v62, %v234_v53  ;;  %v233_v54 = vadd.f32 %v232_v42, %v231_v29 }
 0x11e   :  { %v205_v44 = vpop.f32.mrf.mxu1  ;;  %v237_v18 = vrot.slane %v236_v7, 2 }
 0x11f   :  { %v206_v48 = vadd.f32 %v726_v43, %v205_v44  ;;  %v272_v44 = vrot.slane %v271_v30, 2 }
 0x120   :  { %v238_v32 = vadd.f32 %v237_v18, %v236_v7 }
 0x121   :  { %v241_v56 = vsel %vm154_vm2, %v206_v48, 0.0  ;;  %v225_v48 = vrot.slane %v224_v35, 1 }
 0x122   :  { %v242_v1 = vrot.slane %v241_v56, 4  ;;  %v239_v46 = vrot.slane %v238_v32, 1 }
 0x123   :  { %v226_v59 = vadd.f32 %v225_v48, %v224_v35 }
 0x124   :  { %v243_v10 = vadd.f32 %v242_v1, %v241_v56  ;;  %v273_v56 = vadd.f32 %v272_v44, %v271_v30 }
 0x126   :  { %v208_v57 = vpop.f32.mrf.mxu1  ;;  %v244_v22 = vrot.slane %v243_v10, 2  ;;  %v274_v1 = vrot.slane %v273_v56, 1 }
 0x127   :  { %v209_v61 = vadd.f32 %v726_v43, %v208_v57  ;;  %v240_v57 = vadd.f32 %v239_v46, %v238_v32 }
 0x128   :  { %v245_v36 = vadd.f32 %v244_v22, %v243_v10  ;;  %v275_v11 = vadd.f32 %v274_v1, %v273_v56 }
 0x129   :  { %v248_v2 = vsel %vm154_vm2, %v209_v61, 0.0  ;;  %v282_v61 = vsel %vm281_vm3, %v561_v5, %v280_v51 }
 0x12a   :  { %v249_v3 = vrot.slane %v248_v2, 4  ;;  %v246_v49 = vrot.slane %v245_v36, 1  ;;  %v284_v63 = vmul.f32 %v282_v61, %v233_v54  ;;  %v283_v4 = vmul.f32 %v282_v61, %v226_v59 }
 0x12b   :  { %v290_v17 = vmul.f32 %v282_v61, %v275_v11 }
 0x12c   :  { %v250_v12 = vadd.f32 %v249_v3, %v248_v2  ;;  %v247_v60 = vadd.f32 %v246_v49, %v245_v36  ;;  %v285_v2 = vmul.f32 %v282_v61, %v240_v57  ;;  %v304_v9 = vsel %vm303_vm4, %v284_v63, %v283_v4  ;;  %v407_v63 = vld [vmem:[%s846_s10] sm:$0xff] }
 0x12d   :  { %v19_v4 = vstv %s847_s9 }
 0x12e   :  { %v211_v13 = vpop.f32.mrf.mxu1  ;;  %v251_v26 = vrot.slane %v250_v12, 2  ;;  %v286_v6 = vmul.f32 %v282_v61, %v247_v60  ;;  %v557_v60 = vld [vmem:[%s844_s8] ss:$0 sm:$0xff]  ;;  %20 = vst [vmem:[#allocation2] sm:$0x1] %v19_v4 }
 0x12f   :  { %v212_v15 = vadd.f32 %v726_v43, %v211_v13 }
 0x130   :  { %v252_v39 = vadd.f32 %v251_v26, %v250_v12  ;;  %v306_v12 = vsel %vm305_vm5, %v285_v2, %v304_v9 }
 0x131   :  { %v255_v23 = vsel %vm154_vm2, %v212_v15, 0.0  ;;  %v308_v13 = vsel %vm307_vm6, %v286_v6, %v306_v12 }
 0x132   :  { %v256_v27 = vrot.slane %v255_v23, 4  ;;  %v253_v52 = vrot.slane %v252_v39, 1 }
 0x134   :  { %v257_v33 = vadd.f32 %v256_v27, %v255_v23  ;;  %v254_v62 = vadd.f32 %v253_v52, %v252_v39  ;;  %v349_v23 = vpop.permute.xlu0 %348 }
 0x136   :  { %v258_v40 = vrot.slane %v257_v33, 2  ;;  %v214_v41 = vpop.f32.mrf.mxu1  ;;  %v287_v7 = vmul.f32 %v282_v61, %v254_v62 }
 0x137   :  { %v215_v45 = vadd.f32 %v726_v43, %v214_v41 }
 0x138   :  { %v259_v47 = vadd.f32 %v258_v40, %v257_v33  ;;  %v310_v15 = vsel %vm309_vm7, %v287_v7, %v308_v13 }
 0x139   :  { %v262_v50 = vsel %vm154_vm2, %v215_v45, 0.0 }
 0x13a   :  { %v263_v53 = vrot.slane %v262_v50, 4  ;;  %v260_v55 = vrot.slane %v259_v47, 1 }
 0x13c   :  { %v264_v58 = vadd.f32 %v263_v53, %v262_v50  ;;  %v261_v0 = vadd.f32 %v260_v55, %v259_v47 }
 0x13e   :  { %v265_v43 = vrot.slane %v264_v58, 2  ;;  %v288_v10 = vmul.f32 %v282_v61, %v261_v0 }
 0x140   :  { %v266_v3 = vadd.f32 %v265_v43, %v264_v58  ;;  %v312_v18 = vsel %vm311_vm8, %v288_v10, %v310_v15  ;;  %v408_v43 = vld [vmem:[%s846_s10 + $0x8] sm:$0xff]  ;;  %v558_v10 = vld [vmem:[#allocation2] ss:$0 sm:$0xff] }
 0x142   :  { %v267_v8 = vrot.slane %v266_v3, 1 }
 0x144   :  { %v268_v5 = vadd.f32 %v267_v8, %v266_v3 }
 0x146   :  { %v289_v14 = vmul.f32 %v282_v61, %v268_v5  ;;  %v559_v5 = vld [vmem:[%s845_s11] ss:$0 sm:$0xff] }
 0x148   :  { %v314_v20 = vsel %vm313_vm9, %v289_v14, %v312_v18 }
 0x149   :  { %v316_v22 = vsel %vm315_vm10, %v290_v17, %v314_v20 }
 0x14a   :  { %530 = vmatmul.msk.f32.vlgmr.msra.gmra.mxu2 %vm154_vm2, %v316_v22 }
 0x1cd   :  { %v336_v24 = vpop.f32.mrf.mxu2 }
 0x1ce   :  { %v351_v26 = vadd.f32 %v349_v23, %v336_v24 }
 0x1d0   :  { %v371_v27 = vrot.slane %v351_v26, 4  ;;  %v369_v29 = vrot.slane %v351_v26, 2  ;;  %v368_v30 = vrot.slane %v351_v26, 1  ;;  %v372_v32 = vrot.slane %v351_v26, 5 }
 0x1d1   :  { %v370_v38 = vrot.slane %v351_v26, 3  ;;  %v373_v39 = vrot.slane %v351_v26, 6  ;;  %v374_v52 = vrot.slane %v351_v26, 7  ;;  %v375_v54 = vperm.slane %v351_v26, 0 }
 0x1d2   :  { %v379_v33 = vperm.slane %v371_v27, 0  ;;  %v377_v35 = vperm.slane %v369_v29, 0  ;;  %v376_v36 = vperm.slane %v368_v30, 0  ;;  %v380_v44 = vperm.slane %v372_v32, 0 }
 0x1d3   :  { %v378_v48 = vperm.slane %v370_v38, 0  ;;  %v381_v49 = vperm.slane %v373_v39, 0  ;;  %v391_v57 = vadd.f32 %v375_v54, %v691_v16  ;;  %v410_v16 = vld [vmem:[%s846_s10 + $0x18] sm:$0xff] }
 0x1d4   :  { %v395_v40 = vadd.f32 %v379_v33, %v711_v31  ;;  %v393_v41 = vadd.f32 %v377_v35, %v703_v25  ;;  %v392_v42 = vadd.f32 %v376_v36, %v698_v21  ;;  %v396_v50 = vadd.f32 %v380_v44, %v715_v34  ;;  %546 = vmatpush.msra.mxu3 %v410_v16 }
 0x1d5   :  { %v394_v51 = vadd.f32 %v378_v48, %v707_v28  ;;  %v397_v31 = vadd.f32 %v381_v49, %v719_v37  ;;  %v382_v21 = vperm.slane %v374_v52, 0  ;;  %v399_v59 = vmax.f32 %v391_v57, 0.0  ;;  %v556_v28 = vld [vmem:[%s842_s6] ss:$0 sm:$0xff]  ;;  %467 = vmatpush.msrb.mxu2 %v410_v16 }
 0x1d6   :  { %v403_v45 = vmax.f32 %v395_v40, 0.0  ;;  %v401_v46 = vmax.f32 %v393_v41, 0.0  ;;  %v400_v47 = vmax.f32 %v392_v42, 0.0  ;;  %v404_v25 = vmax.f32 %v396_v50, 0.0 }
 0x1d7   :  { %v402_v53 = vmax.f32 %v394_v51, 0.0  ;;  %v405_v55 = vmax.f32 %v397_v31, 0.0  ;;  %v398_v56 = vadd.f32 %v382_v21, %v695_v19  ;;  %v343_v34 = vadd.f32 %v556_v28, %v336_v24  ;;  %v409_v19 = vld [vmem:[%s846_s10 + $0x10] sm:$0xff] }
 0x1d8   :  { %431 = vrot.lane.b32.xlu2 %v403_v45, %s564_s7  ;;  %427 = vrot.lane.b32.xlu1 %v401_v46, %s564_s7 }
 0x1d9   :  { %425 = vrot.lane.b32.xlu0 %v400_v47, %s564_s7  ;;  %v406_v58 = vmax.f32 %v398_v56, 0.0  ;;  %v344_v37 = vmax.f32 %v343_v34, 0.0  ;;  %547 = vmatpush.msra.mxu3 %v409_v19 }
 0x1da   :  { %468 = vmatpush.msrb.mxu2 %v409_v19 }
 0x1db   :  { %v356_v61 = vmul.f32 %v557_v60, %v344_v37  ;;  %548 = vmatpush.msra.mxu3 %v408_v43 }
 0x1dc   :  { %469 = vmatpush.msrb.mxu2 %v408_v43 }
 0x1dd   :  { %v357_v62 = vsel %vm154_vm2, %v356_v61, 0.0  ;;  %549 = vmatpush.msra.mxu3 %v407_v63 }
 0x1de   :  { %470 = vmatpush.msrb.mxu2 %v407_v63 }
 0x1e0   :  { %433 = vrot.lane.b32.xlu2 %v404_v25, %s564_s7  ;;  %429 = vrot.lane.b32.xlu1 %v402_v53, %s564_s7 }
 0x1e1   :  { %435 = vrot.lane.b32.xlu0 %v405_v55, %s564_s7 }
 0x1e8   :  { %437 = vrot.lane.b32.xlu2 %v406_v58, %s564_s7  ;;  %423 = vrot.lane.b32.xlu1 %v399_v59, %s564_s7 }
 0x20b   :  { %358 = vadd.xlane.f32.xlu0 %v357_v62 }
 0x232   :  { %v432_v6 = vpop.permute.xlu2 %431 }
 0x23a   :  { %v434_v7 = vpop.permute.xlu2 %433 }
 0x242   :  { %v438_v9 = vpop.permute.xlu2 %437 }
 0x24a   :  { %v428_v0 = vpop.permute.xlu1 %427 }
 0x24b   :  { %v426_v1 = vpop.permute.xlu0 %425 }
 0x24c   :  { %532 = vmatmul.msk.f32.vlgmr.msra.gmra.mxu3 %vm154_vm2, %v426_v1 }
 0x252   :  { %v430_v2 = vpop.permute.xlu1 %429 }
 0x253   :  { %v436_v8 = vpop.permute.xlu0 %435 }
 0x254   :  { %533 = vmatmul.msk.f32.gmra.mxu3 %vm154_vm2, %v428_v0 }
 0x25a   :  { %v424_v3 = vpop.permute.xlu1 %423 }
 0x25b   :  { %531 = vmatmul.msk.f32.vlgmr.msrb.gmra.mxu2 %vm154_vm2, %v424_v3 }
 0x25c   :  { %534 = vmatmul.msk.f32.gmra.mxu3 %vm154_vm2, %v430_v2 }
 0x264   :  { %535 = vmatmul.msk.f32.gmra.mxu3 %vm154_vm2, %v432_v6 }
 0x26c   :  { %536 = vmatmul.msk.f32.gmra.mxu3 %vm154_vm2, %v434_v7 }
 0x274   :  { %537 = vmatmul.msk.f32.gmra.mxu3 %vm154_vm2, %v436_v8 }
 0x27c   :  { %538 = vmatmul.msk.f32.gmra.mxu3 %vm154_vm2, %v438_v9 }
 0x27e   :  { %v359_v11 = vpop.xlane.xlu0 %358 }
 0x27f   :  { %v364_v12 = vadd.f32 %v558_v10, %v359_v11 }
 0x281   :  { %366 = vst.msk [vmem:[%s848_s12] sm:$0xff] %vm365_vm11, %v364_v12 }
 0x2cf   :  { %v475_v13 = vpop.f32.mrf.mxu3 }
 0x2d0   :  { %v476_v14 = vadd.f32 %v559_v5, %v475_v13 }
 0x2d2   :  { %498 = vst.msk [vmem:[%s849_s13 + $0x8] sm:$0xff] %vm496_vm12, %v476_v14 }
 0x2d7   :  { %v478_v15 = vpop.f32.mrf.mxu3 }
 0x2d8   :  { %v479_v17 = vadd.f32 %v559_v5, %v478_v15 }
 0x2da   :  { %499 = vst.msk [vmem:[%s849_s13 + $0x10] sm:$0xff] %vm496_vm12, %v479_v17 }
 0x2de   :  { %v472_v18 = vpop.f32.mrf.mxu2 }
 0x2df   :  { %v473_v20 = vadd.f32 %v559_v5, %v472_v18  ;;  %v481_v22 = vpop.f32.mrf.mxu3 }
 0x2e0   :  { %v482_v23 = vadd.f32 %v559_v5, %v481_v22 }
 0x2e1   :  { %497 = vst.msk [vmem:[%s849_s13] sm:$0xff] %vm496_vm12, %v473_v20 }
 0x2e2   :  { %500 = vst.msk [vmem:[%s849_s13 + $0x18] sm:$0xff] %vm496_vm12, %v482_v23 }
 0x2e7   :  { %v484_v24 = vpop.f32.mrf.mxu3 }
 0x2e8   :  { %v485_v26 = vadd.f32 %v559_v5, %v484_v24 }
 0x2ea   :  { %501 = vst.msk [vmem:[%s849_s13 + $0x20] sm:$0xff] %vm496_vm12, %v485_v26 }
 0x2ef   :  { %v487_v27 = vpop.f32.mrf.mxu3 }
 0x2f0   :  { %v488_v29 = vadd.f32 %v559_v5, %v487_v27 }
 0x2f2   :  { %502 = vst.msk [vmem:[%s849_s13 + $0x28] sm:$0xff] %vm496_vm12, %v488_v29 }
 0x2f7   :  { %v490_v30 = vpop.f32.mrf.mxu3 }
 0x2f8   :  { %v491_v32 = vadd.f32 %v559_v5, %v490_v30 }
 0x2fa   :  { %503 = vst.msk [vmem:[%s849_s13 + $0x30] sm:$0xff] %vm496_vm12, %v491_v32 }
 0x2ff   :  { %v493_v33 = vpop.f32.mrf.mxu3 }
 0x300   :  { %v494_v35 = vadd.f32 %v559_v5, %v493_v33 }
 0x302   :  { %504 = vst.msk [vmem:[%s849_s13 + $0x38] sm:$0xff] %vm496_vm12, %v494_v35 }

</bundles_post_ra>
